<compile_context>
chip_gen: v6e
topology: v6e:2x2x1
jax: 0.10.0
libtpu: 0.0.40
codegen_flags: <defaults>
</compile_context>

<pallas_src>
import functools

import jax
import jax.numpy as jnp
from jax.experimental import pallas as pl
from jax.experimental.pallas import tpu as pltpu

# ----------------------------- configuration --------------------------------
QUERY_DIM = 8
NUM_QUERY = QUERY_DIM * QUERY_DIM              # 64
EMBED = 32
LEVEL_CH = (4, 8, 16, 32)
LEVEL_HW = ((8, 8), (4, 4), (2, 2), (1, 1))
NUM_LEVELS = 4
NUM_HEADS = 4
NUM_POINTS = 2
NUM_GROUPS = 4
CG = EMBED // NUM_GROUPS                       # 8
HEAD_DIM = EMBED // NUM_HEADS                  # 8
DEC_CH = dict(vol=64, c16=32, c32=16, c64=8, c128=8, c256=16)
MATCH_CH = 16
EPS = 1e-5

LVL_ROWS = tuple(h * w for (h, w) in LEVEL_HW)                 # (64, 16, 4, 1)
NV = sum(LVL_ROWS)                                             # 85
NV_PAD = 96                                                    # padded value length
LVL_OFF = tuple(sum(LVL_ROWS[:i]) for i in range(NUM_LEVELS))  # (0, 64, 80, 84)
CH_OFF = tuple(sum(LEVEL_CH[:i]) for i in range(NUM_LEVELS))   # (0, 4, 12, 28)
CIN_PAD = 64                                                   # sum(LEVEL_CH)=60 -> 64


# ------------------------- Pallas kernel: matmul+bias -------------------------
def _linear_kernel(x_ref, w_ref, b_ref, o_ref):
    x = x_ref[...].astype(jnp.bfloat16)   # bf16 MXU operands, f32 accumulate
    w = w_ref[...].astype(jnp.bfloat16)
    o_ref[...] = jnp.dot(x, w, preferred_element_type=jnp.float32) + b_ref[...]


def pallas_linear(x, w, b):
    """y = x @ w + b.  x: (M, K) f32, w: (K, N), b: (N,).
    Single whole-array block up to a few thousand rows (review: 128-row tiles
    only reach ~29% of HBM roofline and multiply grid-step overhead)."""
    M, K = x.shape
    N = w.shape[1]
    b2 = b.reshape(1, N)
    TM = None
    if M > 2048:
        for cand in (1024, 512, 256):
            if M % cand == 0:
                TM = cand
                break
    if TM is None:  # whole array as one block (exempt from the (8,128) rule)
        return pl.pallas_call(
            _linear_kernel,
            out_shape=jax.ShapeDtypeStruct((M, N), jnp.float32),
        )(x, w, b2)
    return pl.pallas_call(
        _linear_kernel,
        out_shape=jax.ShapeDtypeStruct((M, N), jnp.float32),
        grid=(M // TM,),
        in_specs=[pl.BlockSpec((TM, K), lambda i: (i, 0)),
                  pl.BlockSpec((K, N), lambda i: (0, 0)),   # weight held resident
                  pl.BlockSpec((1, N), lambda i: (0, 0))],
        out_specs=pl.BlockSpec((TM, N), lambda i: (i, 0)),
        compiler_params=pltpu.CompilerParams(
            dimension_semantics=("parallel",)),
    )(x, w, b2)


# ------- Pallas kernel: ALL levels 1x1 projection + GroupNorm, per branch -----
def _proj_gn_kernel(x_ref, w_ref, bmap_ref, gmap_ref, betmap_ref,
                    chs_ref, chsT_ref, rs_ref, rsT_ref, invn_ref, o_ref):
    # x: (1, B*96, 64)  block-diagonal channel layout (one channel slice per
    # level), w: (1, 64, 32) vertically stacked per-level conv weights,
    # bmap/gmap/betmap: (1, B*96, 32) per-row bias / GN-affine maps.
    x = x_ref[0].astype(jnp.bfloat16)
    w = w_ref[0].astype(jnp.bfloat16)
    y = jnp.dot(x, w, preferred_element_type=jnp.float32) + bmap_ref[0]

    chs, chsT = chs_ref[...], chsT_ref[...]          # (E, G) / (G, E)
    rs, rsT = rs_ref[...], rsT_ref[...]              # (B*96, B*L) / (B*L, B*96)
    invn = invn_ref[...]                             # (B*L, 1)

    # Group statistics via 0/1 selector matmuls (keeps the work on the idle MXU,
    # no masked 8-lane sub-slices on the VPU/XLU).
    g1 = jnp.dot(y, chs, preferred_element_type=jnp.float32)          # (rows, G)
    g2 = jnp.dot(y * y, chs, preferred_element_type=jnp.float32)
    mean = jnp.dot(rsT, g1, preferred_element_type=jnp.float32) * invn   # (B*L, G)
    ex2 = jnp.dot(rsT, g2, preferred_element_type=jnp.float32) * invn
    var = jnp.maximum(ex2 - mean * mean, 0.0)
    mean_full = jnp.dot(jnp.dot(rs, mean, preferred_element_type=jnp.float32),
                        chsT, preferred_element_type=jnp.float32)        # (rows, E)
    var_full = jnp.dot(jnp.dot(rs, var, preferred_element_type=jnp.float32),
                       chsT, preferred_element_type=jnp.float32)
    rowmask = jnp.sum(rs, axis=1, keepdims=True)     # 0 for padded rows
    yn = (y - mean_full) * jax.lax.rsqrt(var_full + EPS)
    o_ref[0] = (yn * gmap_ref[0] + betmap_ref[0]) * rowmask


def pallas_proj_groupnorm(x, w, bmap, gmap, betmap, chs, chsT, rs, rsT, invn):
    G, R, Cin = x.shape
    return pl.pallas_call(
        _proj_gn_kernel,
        out_shape=jax.ShapeDtypeStruct((G, R, EMBED), jnp.float32),
        grid=(G,),
        in_specs=[pl.BlockSpec((1, R, Cin), lambda g: (g, 0, 0)),
                  pl.BlockSpec((1, Cin, EMBED), lambda g: (g, 0, 0)),
                  pl.BlockSpec((1, R, EMBED), lambda g: (g, 0, 0)),
                  pl.BlockSpec((1, R, EMBED), lambda g: (g, 0, 0)),
                  pl.BlockSpec((1, R, EMBED), lambda g: (g, 0, 0)),
                  pl.BlockSpec(chs.shape, lambda g: (0, 0)),
                  pl.BlockSpec(chsT.shape, lambda g: (0, 0)),
                  pl.BlockSpec(rs.shape, lambda g: (0, 0)),
                  pl.BlockSpec(rsT.shape, lambda g: (0, 0)),
                  pl.BlockSpec(invn.shape, lambda g: (0, 0))],
        out_specs=pl.BlockSpec((1, R, EMBED), lambda g: (g, 0, 0)),
        compiler_params=pltpu.CompilerParams(
            dimension_semantics=("parallel",)),
    )(x, w, bmap, gmap, betmap, chs, chsT, rs, rsT, invn)


def prepare_values(sat_features, osm_features, proj_sat, proj_osm, B):
    """ONE pallas_call (grid over the 2 branches) doing every level's 1x1
    projection + GroupNorm.  Levels are concatenated along the value axis with
    a block-diagonal channel layout so one matmul covers all four conv weights;
    GroupNorm is segmented per (batch, level, group) via selector matmuls."""
    def build_x(features):
        rows = []
        for l, f in enumerate(features):
            C = LEVEL_CH[l]
            H, W = LEVEL_HW[l]
            xl = jnp.transpose(f, (0, 2, 3, 1)).reshape(B, H * W, C)
            xl = jnp.pad(xl, ((0, 0), (0, 0),
                              (CH_OFF[l], CIN_PAD - CH_OFF[l] - C)))
            rows.append(xl)
        x = jnp.concatenate(rows, axis=1)                        # (B, 85, 64)
        x = jnp.pad(x, ((0, 0), (0, NV_PAD - NV), (0, 0)))       # (B, 96, 64)
        return x.reshape(B * NV_PAD, CIN_PAD)

    def build_params(proj):
        w = jnp.concatenate([proj[l]["conv_w"] for l in range(NUM_LEVELS)],
                            axis=0)                              # (60, 32)
        w = jnp.pad(w, ((0, CIN_PAD - w.shape[0]), (0, 0)))      # (64, 32)

        def rowmap(key):
            parts = [jnp.broadcast_to(proj[l][key][None, :],
                                      (LVL_ROWS[l], EMBED))
                     for l in range(NUM_LEVELS)]
            m = jnp.concatenate(parts, axis=0)
            m = jnp.pad(m, ((0, NV_PAD - NV), (0, 0)))
            return jnp.tile(m, (B, 1))                           # (B*96, 32)

        return w, rowmap("conv_b"), rowmap("gn_gamma"), rowmap("gn_beta")

    x = jnp.stack([build_x(sat_features), build_x(osm_features)])
    ws, bs, gs, bes = build_params(proj_sat)
    wo, bo, go, beo = build_params(proj_osm)
    w = jnp.stack([ws, wo])
    bmap = jnp.stack([bs, bo])
    gmap = jnp.stack([gs, go])
    betmap = jnp.stack([bes, beo])

    chs = (jnp.arange(EMBED)[:, None] // CG
           == jnp.arange(NUM_GROUPS)[None, :]).astype(jnp.float32)      # (E, G)
    lvl_id = jnp.concatenate(
        [jnp.full((LVL_ROWS[l],), l, jnp.int32) for l in range(NUM_LEVELS)]
        + [jnp.full((NV_PAD - NV,), -1, jnp.int32)])
    rowsel96 = (lvl_id[:, None]
                == jnp.arange(NUM_LEVELS)[None, :]).astype(jnp.float32)  # (96, L)
    rs = jnp.kron(jnp.eye(B, dtype=jnp.float32), rowsel96)               # (B*96, B*L)
    rsT = rs.T
    invn = jnp.tile(1.0 / (jnp.array(LVL_ROWS, jnp.float32) * CG),
                    (B,)).reshape(B * NUM_LEVELS, 1)

    out = pallas_proj_groupnorm(x, w, bmap, gmap, betmap,
                                chs, chs.T, rs, rsT, invn)
    out = out.reshape(2, B, NV_PAD, EMBED)
    return out[0], out[1]          # (B, 96, 32) each, padded rows zeroed


# ------------------- dense sampling matrix (XLA wrapper) ----------------------
def build_sampling_matrix(sampling_locations, attention_weights):
    """Attention-weighted bilinear weights as a dense (B, Hh, Nq, NV_PAD) f32
    matrix (value axis padded to 96 so the MXU sees a clean K dim).
    TODO(synk): at original shapes this is GB-scale; replace with an in-kernel
    gather (scalar-prefetched indices + DMA from values in pl.ANY)."""
    B = sampling_locations.shape[0]
    blocks = []
    for lvl, (Hl, Wl) in enumerate(LEVEL_HW):
        loc = sampling_locations[:, :, :, lvl]                 # (B,Nq,Hh,P,2)
        aw = attention_weights[:, :, :, lvl]                   # (B,Nq,Hh,P)
        x = loc[..., 0] * Wl - 0.5
        y = loc[..., 1] * Hl - 0.5
        x0 = jnp.floor(x)
        y0 = jnp.floor(y)
        acc = jnp.zeros((B, NUM_HEADS, NUM_QUERY, Hl * Wl), jnp.float32)
        for xi, wx in ((x0, x0 + 1.0 - x), (x0 + 1.0, x - x0)):
            for yi, wy in ((y0, y0 + 1.0 - y), (y0 + 1.0, y - y0)):
                ok = ((xi >= 0) & (xi < Wl) & (yi >= 0) & (yi < Hl))
                xc = jnp.clip(xi, 0, Wl - 1).astype(jnp.int32)
                yc = jnp.clip(yi, 0, Hl - 1).astype(jnp.int32)
                idx = yc * Wl + xc
                onehot = (idx[..., None] ==
                          jnp.arange(Hl * Wl, dtype=jnp.int32)).astype(jnp.float32)
                wgt = wx * wy * ok.astype(jnp.float32) * aw
                acc = acc + jnp.einsum('bqhpv,bqhp->bhqv', onehot, wgt)
        blocks.append(acc)
    blocks.append(jnp.zeros((B, NUM_HEADS, NUM_QUERY, NV_PAD - NV), jnp.float32))
    return jnp.concatenate(blocks, axis=-1)                    # (B, Hh, Nq, 96)


def msdeform_sampling_matrices(p_sat, p_osm, query, reference_points, B):
    """Sampling-offset + attention-weight projections of BOTH branches fused
    into one lane-dense (N=192) matmul, then the dense sampling matrices."""
    q2 = query.reshape(B * NUM_QUERY, EMBED)
    n_off = NUM_HEADS * NUM_LEVELS * NUM_POINTS * 2
    n_aw = NUM_HEADS * NUM_LEVELS * NUM_POINTS
    w_cat = jnp.concatenate([p_sat["off_w"], p_sat["aw_w"],
                             p_osm["off_w"], p_osm["aw_w"]], axis=1)
    b_cat = jnp.concatenate([p_sat["off_b"], p_sat["aw_b"],
                             p_osm["off_b"], p_osm["aw_b"]])
    proj = pallas_linear(q2, w_cat, b_cat)                     # (B*Nq, 192)

    offset_normalizer = jnp.array([[w, h] for (h, w) in LEVEL_HW], jnp.float32)

    def branch(off_flat, aw_flat):
        off = off_flat.reshape(B, NUM_QUERY, NUM_HEADS, NUM_LEVELS,
                               NUM_POINTS, 2)
        aw = jax.nn.softmax(
            aw_flat.reshape(B, NUM_QUERY, NUM_HEADS, NUM_LEVELS * NUM_POINTS),
            axis=-1).reshape(B, NUM_QUERY, NUM_HEADS, NUM_LEVELS, NUM_POINTS)
        loc = (reference_points[:, :, None, :, None, :]
               + off / offset_normalizer[None, None, None, :, None, :])
        # bf16 in the wrapper so the tail's DMA already moves bf16
        return build_sampling_matrix(loc, aw).astype(jnp.bfloat16)

    W_sat = branch(proj[:, :n_off], proj[:, n_off:n_off + n_aw])
    o1 = n_off + n_aw
    W_osm = branch(proj[:, o1:o1 + n_off],
                   proj[:, o1 + n_off:o1 + n_off + n_aw])
    return W_sat, W_osm


# ---- Pallas kernel: value proj + sampling + out-proj + fuse + 3xLN + match ----
def _attn_tail_kernel(ws_ref, wo_ref, vs_ref, vo_ref, q_ref,
                      vw_ref, vb_ref, ow_ref, ob_ref, hm_ref, ln_ref,
                      mw_ref, mb_ref, out_ref, *, alpha):
    q = q_ref[0]                                               # (Nq, E) f32

    def branch(w_ref, val_ref, bi):
        # value projection (bf16 MXU operands, f32 accumulate)
        val = val_ref[0].astype(jnp.bfloat16)                  # (NV_PAD, E)
        v = jnp.dot(val, vw_ref[bi].astype(jnp.bfloat16),
                    preferred_element_type=jnp.float32) + vb_ref[bi]
        # per-head attention-weighted bilinear sampling as K=96 matmuls; head
        # channels selected with a per-head 0/1 mask so the per-head partial
        # results land directly in their output columns (no concat/relayout).
        s = jnp.zeros((NUM_QUERY, EMBED), jnp.float32)
        for h in range(NUM_HEADS):
            vh = (v * hm_ref[h]).astype(jnp.bfloat16)          # (NV_PAD, E)
            s = s + jnp.dot(w_ref[0, h], vh,
                            preferred_element_type=jnp.float32)
        # ONE out-projection dot with full K=E (review: no K=Dh=8 micro-dots)
        att = jnp.dot(s.astype(jnp.bfloat16),
                      ow_ref[bi].astype(jnp.bfloat16),
                      preferred_element_type=jnp.float32)
        return att + ob_ref[bi] + q     # mmcv residual (identity = query)

    sat_att = branch(ws_ref, vs_ref, 0)
    osm_att = branch(wo_ref, vo_ref, 1)
    fused = alpha * sat_att + (1.0 - alpha) * osm_att

    def ln(x, g, b):
        mu = jnp.mean(x, axis=-1, keepdims=True)
        var = jnp.mean((x - mu) ** 2, axis=-1, keepdims=True)
        return (x - mu) * jax.lax.rsqrt(var + EPS) * g + b

    # NOTE: the PyTorch reference adds Q twice (once inside the deformable
    # attention as the identity residual, once before every LayerNorm).
    f_ln = ln(fused + q, ln_ref[0], ln_ref[1])
    s_ln = ln(sat_att + q, ln_ref[2], ln_ref[3])
    o_ln = ln(osm_att + q, ln_ref[4], ln_ref[5])
    # match_input 1x1 conv fused into the epilogue (commutes with the upsample)
    m = jnp.dot(f_ln.astype(jnp.bfloat16), mw_ref[...].astype(jnp.bfloat16),
                preferred_element_type=jnp.float32) + mb_ref[...]
    # lane-dense packed output: [fused | sat | osm | match]
    out_ref[0] = jnp.concatenate([f_ln, s_ln, o_ln, m], axis=-1)


def pallas_attention_tail(alpha, W_sat, W_osm, val_sat, val_osm, query,
                          p_sat, p_osm, ln_params, match_w, match_b, B):
    vw = jnp.stack([p_sat["value_w"], p_osm["value_w"]])
    vb = jnp.stack([p_sat["value_b"], p_osm["value_b"]]).reshape(2, 1, EMBED)
    ow = jnp.stack([p_sat["out_w"], p_osm["out_w"]])
    ob = jnp.stack([p_sat["out_b"], p_osm["out_b"]]).reshape(2, 1, EMBED)
    hm = (jnp.arange(NUM_HEADS)[:, None]
          == jnp.arange(EMBED)[None, :] // HEAD_DIM
          ).astype(jnp.float32).reshape(NUM_HEADS, 1, EMBED)
    ln = jnp.stack(ln_params).reshape(6, 1, EMBED)
    mb = match_b.reshape(1, MATCH_CH)

    Nq = NUM_QUERY
    NOUT = 3 * EMBED + MATCH_CH
    kernel = functools.partial(_attn_tail_kernel, alpha=float(alpha))
    return pl.pallas_call(
        kernel,
        out_shape=jax.ShapeDtypeStruct((B, Nq, NOUT), jnp.float32),
        grid=(B,),
        in_specs=[pl.BlockSpec((1, NUM_HEADS, Nq, NV_PAD), lambda b: (b, 0, 0, 0)),
                  pl.BlockSpec((1, NUM_HEADS, Nq, NV_PAD), lambda b: (b, 0, 0, 0)),
                  pl.BlockSpec((1, NV_PAD, EMBED), lambda b: (b, 0, 0)),
                  pl.BlockSpec((1, NV_PAD, EMBED), lambda b: (b, 0, 0)),
                  pl.BlockSpec((1, Nq, EMBED), lambda b: (b, 0, 0)),
                  pl.BlockSpec((2, EMBED, EMBED), lambda b: (0, 0, 0)),
                  pl.BlockSpec((2, 1, EMBED), lambda b: (0, 0, 0)),
                  pl.BlockSpec((2, EMBED, EMBED), lambda b: (0, 0, 0)),
                  pl.BlockSpec((2, 1, EMBED), lambda b: (0, 0, 0)),
                  pl.BlockSpec((NUM_HEADS, 1, EMBED), lambda b: (0, 0, 0)),
                  pl.BlockSpec((6, 1, EMBED), lambda b: (0, 0, 0)),
                  pl.BlockSpec((EMBED, MATCH_CH), lambda b: (0, 0)),
                  pl.BlockSpec((1, MATCH_CH), lambda b: (0, 0))],
        out_specs=pl.BlockSpec((1, Nq, NOUT), lambda b: (b, 0, 0)),
        compiler_params=pltpu.CompilerParams(
            dimension_semantics=("parallel",)),
    )(W_sat, W_osm, val_sat, val_osm, query, vw, vb, ow, ob, hm, ln,
      match_w, mb)


# ------------------------------- JAX glue -------------------------------------
def avgpool2_nhwc(x):
    B, H, W, C = x.shape
    return x.reshape(B, H // 2, 2, W // 2, 2, C).mean(axis=(2, 4))


def upsample_nhwc(x, size):
    B, _, _, C = x.shape
    return jax.image.resize(x, (B, size[0], size[1], C), method="bilinear")


def pyramid_nhwc(x):
    # TODO(synk): PyramidMs is an external module; approximated here with
    # parameter-free avg-pool downsampling to (1, 1/2, 1/4, 1/8) resolutions.
    p128 = x
    p64 = avgpool2_nhwc(p128)
    p32 = avgpool2_nhwc(p64)
    p16 = avgpool2_nhwc(p32)
    return p128, p64, p32, p16


def nhwc_rows_to_nchw(rows, B, H, W, C):
    return jnp.transpose(rows.reshape(B, H, W, C), (0, 3, 1, 2))


# --------------------------- merged output decoders ---------------------------
def decoders_apply(dec_list, pyr_list, B):
    """All three output decoders (fused/sat/osm) in TWO lane-dense pallas
    matmuls: the c256 heads (big-M input) in one call, all remaining heads in
    the other (N = 3 branches x 128 channels = 384)."""
    Qd = QUERY_DIM
    ups = [upsample_nhwc(p[0], (2 * Qd, 2 * Qd)) for p in pyr_list]

    xA = jnp.concatenate([u.reshape(-1, EMBED) for u in ups], axis=0)
    wA = jnp.concatenate([d["c256_w"] for d in dec_list], axis=1)
    bA = jnp.concatenate([d["c256_b"] for d in dec_list], axis=0)
    yA = pallas_linear(xA, wA, bA)                    # (3*B*(2Q)^2, 48)

    names = ("c128", "c64", "c32", "c16", "vol")
    xB = jnp.concatenate(
        [lvl.reshape(-1, EMBED) for p in pyr_list for lvl in p], axis=0)
    wB = jnp.concatenate(
        [jnp.concatenate([d[n + "_w"] for n in names], axis=1)
         for d in dec_list], axis=1)
    bB = jnp.concatenate(
        [jnp.concatenate([d[n + "_b"] for n in names], axis=0)
         for d in dec_list], axis=0)
    yB = pallas_linear(xB, wB, bB)                    # (3*B*85, 384)

    hw = (Qd * Qd, (Qd // 2) ** 2, (Qd // 4) ** 2, (Qd // 8) ** 2)
    per_branch_rows = B * sum(hw)
    per_branch_cols = sum(DEC_CH[n] for n in names)   # 128
    col_off = {}
    off = 0
    for n in names:
        col_off[n] = off
        off += DEC_CH[n]

    nA = 2 * Qd
    results = []
    for g in range(len(dec_list)):
        rA = g * B * nA * nA
        r0 = nhwc_rows_to_nchw(
            yA[rA:rA + B * nA * nA,
               g * DEC_CH["c256"]:(g + 1) * DEC_CH["c256"]],
            B, nA, nA, DEC_CH["c256"])
        rb = g * per_branch_rows
        cb = g * per_branch_cols

        def grab(name, Hs, rows, start):
            c0 = cb + col_off[name]
            return nhwc_rows_to_nchw(
                yB[start:start + rows, c0:c0 + DEC_CH[name]],
                B, Hs, Hs, DEC_CH[name])

        s = rb
        r2 = grab("c128", Qd, B * hw[0], s); s += B * hw[0]
        r4 = grab("c64", Qd // 2, B * hw[1], s); s += B * hw[1]
        r10 = grab("c32", Qd // 4, B * hw[2], s); s += B * hw[2]
        r15 = grab("c16", Qd // 8, B * hw[3], s)
        rvol = grab("vol", Qd // 8, B * hw[3], s)
        results.append((r0, r2, r4, r10, r15, rvol))
    return results


# ------------------------------ full forward ----------------------------------
def deformable_fusion_forward(params, osm_features, sat_features, osm_0, sat_0,
                              batch_size):
    B = batch_size
    # TODO(synk): PositionEmbeddingLearned is external; modeled as a learned
    # (num_query, embed) table broadcast over the batch.
    pos = jnp.broadcast_to(params["pos_embed"][None], (B, NUM_QUERY, EMBED))
    learnable_Q = jnp.broadcast_to(params["query_embed"][None],
                                   (B, NUM_QUERY, EMBED))
    Q = learnable_Q + pos

    cda = params["cross_da1"]
    # pallas_call #1: all levels x (1x1 proj + GroupNorm), both branches
    val_sat, val_osm = prepare_values(sat_features, osm_features,
                                      cda["proj_sat"], cda["proj_osm"], B)

    lin = jnp.linspace(0.0, 1.0, QUERY_DIM)
    gx, gy = jnp.meshgrid(lin, lin, indexing="xy")
    reference_points = jnp.stack([gx, gy], axis=-1).reshape(1, -1, 1, 2)

    # pallas_call #2: fused offset + attention-weight projections
    W_sat, W_osm = msdeform_sampling_matrices(cda["msda_sat"], cda["msda_osm"],
                                              Q, reference_points, B)

    alpha = 0.5  # alpha_type == 0
    # pallas_call #3: value proj + sampling + out-proj + fuse + 3xLN + match conv
    packed = pallas_attention_tail(
        alpha, W_sat, W_osm, val_sat, val_osm, Q,
        cda["msda_sat"], cda["msda_osm"],
        (cda["norm_g"], cda["norm_b"], cda["norm_sat_g"], cda["norm_sat_b"],
         cda["norm_osm_g"], cda["norm_osm_b"]),
        params["match_w"], params["match_b"], B)          # (B, Nq, 112)

    fused_map = packed[:, :, :EMBED].reshape(B, QUERY_DIM, QUERY_DIM, EMBED)
    sat_map = packed[:, :, EMBED:2 * EMBED].reshape(B, QUERY_DIM, QUERY_DIM,
                                                    EMBED)
    osm_map = packed[:, :, 2 * EMBED:3 * EMBED].reshape(B, QUERY_DIM, QUERY_DIM,
                                                        EMBED)
    match8 = packed[:, :, 3 * EMBED:].reshape(B, QUERY_DIM, QUERY_DIM, MATCH_CH)

    pyramids = [pyramid_nhwc(fused_map), pyramid_nhwc(sat_map),
                pyramid_nhwc(osm_map)]
    # pallas_calls #4 and #5: merged decoders
    dec_fused, dec_sat, dec_osm = decoders_apply(
        [params["dec"], params["dec_sat"], params["dec_osm"]], pyramids, B)

    # match_input: its 1x1 conv already ran in the tail epilogue; only the
    # bilinear upsample remains (1x1 conv and bilinear resize commute exactly).
    fm = upsample_nhwc(match8, (2 * QUERY_DIM, 2 * QUERY_DIM))
    osm0 = jnp.transpose(osm_0, (0, 2, 3, 1))
    sat0 = jnp.transpose(sat_0, (0, 2, 3, 1))
    skip = fm + osm0 + sat0
    # to_image: Conv(16->3) applied BEFORE the final upsample (they commute),
    # so the matmul runs at the smaller resolution.  pallas_call #6.
    img_rows = pallas_linear(skip.reshape(-1, MATCH_CH),
                             params["to_image_w"], params["to_image_b"])
    img16 = img_rows.reshape(B, 2 * QUERY_DIM, 2 * QUERY_DIM, 3)
    img = jnp.transpose(
        upsample_nhwc(img16, (4 * QUERY_DIM, 4 * QUERY_DIM)), (0, 3, 1, 2))

    alpha_out = jnp.array([[alpha]], jnp.float32)
    return (*dec_fused, *dec_sat, *dec_osm, img, alpha_out)


# ------------------------------ parameter init --------------------------------
def init_params(key):
    keys = iter(jax.random.split(key, 256))
    nk = lambda: next(keys)

    def lin(fan_in, fan_out):
        w = jax.random.normal(nk(), (fan_in, fan_out), jnp.float32) / jnp.sqrt(fan_in)
        b = jax.random.normal(nk(), (fan_out,), jnp.float32) * 0.01
        return w, b

    def make_msda():
        vw, vb = lin(EMBED, EMBED)
        ow, ob = lin(EMBED, NUM_HEADS * NUM_LEVELS * NUM_POINTS * 2)
        aw, ab = lin(EMBED, NUM_HEADS * NUM_LEVELS * NUM_POINTS)
        uw, ub = lin(EMBED, EMBED)
        return dict(value_w=vw, value_b=vb, off_w=ow, off_b=ob,
                    aw_w=aw, aw_b=ab, out_w=uw, out_b=ub)

    def make_proj():
        out = []
        for c in LEVEL_CH:
            w, b = lin(c, EMBED)
            out.append(dict(conv_w=w, conv_b=b,
                            gn_gamma=jnp.ones((EMBED,), jnp.float32),
                            gn_beta=jnp.zeros((EMBED,), jnp.float32)))
        return out

    def make_decoder():
        d = {}
        for name in ("vol", "c16", "c32", "c64", "c128", "c256"):
            w, b = lin(EMBED, DEC_CH[name])
            d[name + "_w"] = w
            d[name + "_b"] = b
        return d

    ones = jnp.ones((EMBED,), jnp.float32)
    zeros = jnp.zeros((EMBED,), jnp.float32)
    cross_da1 = dict(
        proj_sat=make_proj(), proj_osm=make_proj(),
        msda_sat=make_msda(), msda_osm=make_msda(),
        norm_g=ones, norm_b=zeros,
        norm_sat_g=ones, norm_sat_b=zeros,
        norm_osm_g=ones, norm_osm_b=zeros)

    match_w, match_b = lin(EMBED, MATCH_CH)
    img_w, img_b = lin(MATCH_CH, 3)
    return dict(
        pos_embed=jax.random.normal(nk(), (NUM_QUERY, EMBED), jnp.float32) * 0.02,
        query_embed=jax.random.normal(nk(), (NUM_QUERY, EMBED), jnp.float32) * 0.02,
        cross_da1=cross_da1,
        match_w=match_w, match_b=match_b,
        to_image_w=img_w, to_image_b=img_b,
        dec=make_decoder(), dec_sat=make_decoder(), dec_osm=make_decoder())


# --------------------------------- main ---------------------------------------
if __name__ == "__main__":
    key = jax.random.PRNGKey(0)
    kparam, kfeat = jax.random.split(key)
    params = init_params(kparam)

    B = 2
    ks = jax.random.split(kfeat, 2 * NUM_LEVELS + 2)
    sat_features = [
        jax.random.normal(ks[i], (B, LEVEL_CH[i], *LEVEL_HW[i]), jnp.float32)
        for i in range(NUM_LEVELS)]
    osm_features = [
        jax.random.normal(ks[NUM_LEVELS + i], (B, LEVEL_CH[i], *LEVEL_HW[i]),
                          jnp.float32)
        for i in range(NUM_LEVELS)]
    osm_0 = jax.random.normal(ks[-2], (B, MATCH_CH, 2 * QUERY_DIM, 2 * QUERY_DIM),
                              jnp.float32)
    sat_0 = jax.random.normal(ks[-1], (B, MATCH_CH, 2 * QUERY_DIM, 2 * QUERY_DIM),
                              jnp.float32)

    fwd = jax.jit(deformable_fusion_forward, static_argnums=(5,))
    outs = fwd(params, osm_features, sat_features, osm_0, sat_0, B)
    jax.block_until_ready(outs)
    assert len(outs) == 20
    print("KERNEL_OK")
</pallas_src>

<mosaic_0001>
module attributes {stable_mosaic.version = 11 : i64} {
  func.func @_linear_kernel(%arg0: memref<128x32xf32, #tpu.memory_space<vmem>>, %arg1: memref<32x192xf32, #tpu.memory_space<vmem>>, %arg2: memref<1x192xf32, #tpu.memory_space<vmem>>, %arg3: memref<128x192xf32, #tpu.memory_space<vmem>>) attributes {dimension_semantics = [], scalar_prefetch = 0 : i64, scratch_operands = 0 : i64, tpu.core_type = #tpu.core_type<tc>} {
    %c0 = arith.constant 0 : index
    %c0_0 = arith.constant 0 : index
    %0 = vector.load %arg0[%c0, %c0_0] : memref<128x32xf32, #tpu.memory_space<vmem>>, vector<128x32xf32>
    %1 = arith.truncf %0 : vector<128x32xf32> to vector<128x32xbf16>
    %c0_1 = arith.constant 0 : index
    %c0_2 = arith.constant 0 : index
    %2 = vector.load %arg1[%c0_1, %c0_2] : memref<32x192xf32, #tpu.memory_space<vmem>>, vector<32x192xf32>
    %3 = arith.truncf %2 : vector<32x192xf32> to vector<32x192xbf16>
    %cst = arith.constant dense<0.000000e+00> : vector<128x192xf32>
    %4 = tpu.matmul %1, %3, %cst {dimension_numbers = #tpu.dot_dimension_numbers<[1], [0], [0], [1], [0, 0, 1, 1], [], []>} : vector<128x32xbf16>, vector<32x192xbf16>, vector<128x192xf32> -> vector<128x192xf32>
    %c0_3 = arith.constant 0 : index
    %c0_4 = arith.constant 0 : index
    %5 = vector.load %arg2[%c0_3, %c0_4] : memref<1x192xf32, #tpu.memory_space<vmem>>, vector<1x192xf32>
    %6 = vector.broadcast %5 : vector<1x192xf32> to vector<128x192xf32>
    %7 = arith.addf %4, %6 : vector<128x192xf32>
    %c0_5 = arith.constant 0 : index
    %c0_6 = arith.constant 0 : index
    %8 = vector.load %arg3[%c0_5, %c0_6] : memref<128x192xf32, #tpu.memory_space<vmem>>, vector<128x192xf32>
    tpu.vector_store %arg3[%c0_5, %c0_6], %7 {strides = array<i32>} : memref<128x192xf32, #tpu.memory_space<vmem>>, vector<128x192xf32>,
    return
  }
}

module attributes {stable_mosaic.version = 11 : i64} {
  func.func @_proj_gn_kernel(%arg0: i32, %arg1: memref<1x192x64xf32, #tpu.memory_space<vmem>>, %arg2: memref<1x64x32xf32, #tpu.memory_space<vmem>>, %arg3: memref<1x192x32xf32, #tpu.memory_space<vmem>>, %arg4: memref<1x192x32xf32, #tpu.memory_space<vmem>>, %arg5: memref<1x192x32xf32, #tpu.memory_space<vmem>>, %arg6: memref<32x4xf32, #tpu.memory_space<vmem>>, %arg7: memref<4x32xf32, #tpu.memory_space<vmem>>, %arg8: memref<192x8xf32, #tpu.memory_space<vmem>>, %arg9: memref<8x192xf32, #tpu.memory_space<vmem>>, %arg10: memref<8x1xf32, #tpu.memory_space<vmem>>, %arg11: memref<1x192x32xf32, #tpu.memory_space<vmem>>) attributes {dimension_semantics = [#tpu.dimension_semantics<parallel>], iteration_bounds = array<i64: 2>, scalar_prefetch = 0 : i64, scratch_operands = 0 : i64, tpu.core_type = #tpu.core_type<tc>, window_params = [{transform_indices = @transform_0, window_bounds = array<i64: 1, 192, 64>}, {transform_indices = @transform_1, window_bounds = array<i64: 1, 64, 32>}, {transform_indices = @transform_2, window_bounds = array<i64: 1, 192, 32>}, {transform_indices = @transform_3, window_bounds = array<i64: 1, 192, 32>}, {transform_indices = @transform_4, window_bounds = array<i64: 1, 192, 32>}, {pipeline_mode = #tpu.pipeline_mode<synchronous>, transform_indices = @transform_5, window_bounds = array<i64: 32, 4>}, {pipeline_mode = #tpu.pipeline_mode<synchronous>, transform_indices = @transform_6, window_bounds = array<i64: 4, 32>}, {pipeline_mode = #tpu.pipeline_mode<synchronous>, transform_indices = @transform_7, window_bounds = array<i64: 192, 8>}, {pipeline_mode = #tpu.pipeline_mode<synchronous>, transform_indices = @transform_8, window_bounds = array<i64: 8, 192>}, {pipeline_mode = #tpu.pipeline_mode<synchronous>, transform_indices = @transform_9, window_bounds = array<i64: 8, 1>}, {transform_indices = @transform_10, window_bounds = array<i64: 1, 192, 32>}]} {
    %c0 = arith.constant 0 : index
    %c0_0 = arith.constant 0 : index
    %c0_1 = arith.constant 0 : index
    %0 = vector.load %arg1[%c0, %c0_0, %c0_1] : memref<1x192x64xf32, #tpu.memory_space<vmem>>, vector<1x192x64xf32>
    %1 = vector.shape_cast %0 : vector<1x192x64xf32> to vector<192x64xf32>
    %2 = arith.truncf %1 : vector<192x64xf32> to vector<192x64xbf16>
    %c0_2 = arith.constant 0 : index
    %c0_3 = arith.constant 0 : index
    %c0_4 = arith.constant 0 : index
    %3 = vector.load %arg2[%c0_2, %c0_3, %c0_4] : memref<1x64x32xf32, #tpu.memory_space<vmem>>, vector<1x64x32xf32>
    %4 = vector.shape_cast %3 : vector<1x64x32xf32> to vector<64x32xf32>
    %5 = arith.truncf %4 : vector<64x32xf32> to vector<64x32xbf16>
    %cst = arith.constant dense<0.000000e+00> : vector<192x32xf32>
    %6 = tpu.matmul %2, %5, %cst {dimension_numbers = #tpu.dot_dimension_numbers<[1], [0], [0], [1], [0, 0, 1, 1], [], []>} : vector<192x64xbf16>, vector<64x32xbf16>, vector<192x32xf32> -> vector<192x32xf32>
    %c0_5 = arith.constant 0 : index
    %c0_6 = arith.constant 0 : index
    %c0_7 = arith.constant 0 : index
    %7 = vector.load %arg3[%c0_5, %c0_6, %c0_7] : memref<1x192x32xf32, #tpu.memory_space<vmem>>, vector<1x192x32xf32>
    %8 = vector.shape_cast %7 : vector<1x192x32xf32> to vector<192x32xf32>
    %9 = arith.addf %6, %8 : vector<192x32xf32>
    %c0_8 = arith.constant 0 : index
    %c0_9 = arith.constant 0 : index
    %10 = vector.load %arg6[%c0_8, %c0_9] : memref<32x4xf32, #tpu.memory_space<vmem>>, vector<32x4xf32>
    %c0_10 = arith.constant 0 : index
    %c0_11 = arith.constant 0 : index
    %11 = vector.load %arg7[%c0_10, %c0_11] : memref<4x32xf32, #tpu.memory_space<vmem>>, vector<4x32xf32>
    %c0_12 = arith.constant 0 : index
    %c0_13 = arith.constant 0 : index
    %12 = vector.load %arg8[%c0_12, %c0_13] : memref<192x8xf32, #tpu.memory_space<vmem>>, vector<192x8xf32>
    %c0_14 = arith.constant 0 : index
    %c0_15 = arith.constant 0 : index
    %13 = vector.load %arg9[%c0_14, %c0_15] : memref<8x192xf32, #tpu.memory_space<vmem>>, vector<8x192xf32>
    %c0_16 = arith.constant 0 : index
    %c0_17 = arith.constant 0 : index
    %14 = vector.load %arg10[%c0_16, %c0_17] : memref<8x1xf32, #tpu.memory_space<vmem>>, vector<8x1xf32>
    %cst_18 = arith.constant dense<0.000000e+00> : vector<192x4xf32>
    %15 = tpu.matmul %9, %10, %cst_18 {dimension_numbers = #tpu.dot_dimension_numbers<[1], [0], [0], [1], [0, 0, 1, 1], [], []>} : vector<192x32xf32>, vector<32x4xf32>, vector<192x4xf32> -> vector<192x4xf32>
    %16 = arith.mulf %9, %9 : vector<192x32xf32>
    %cst_19 = arith.constant dense<0.000000e+00> : vector<192x4xf32>
    %17 = tpu.matmul %16, %10, %cst_19 {dimension_numbers = #tpu.dot_dimension_numbers<[1], [0], [0], [1], [0, 0, 1, 1], [], []>} : vector<192x32xf32>, vector<32x4xf32>, vector<192x4xf32> -> vector<192x4xf32>
    %cst_20 = arith.constant dense<0.000000e+00> : vector<8x4xf32>
    %18 = tpu.matmul %13, %15, %cst_20 {dimension_numbers = #tpu.dot_dimension_numbers<[1], [0], [0], [1], [0, 0, 1, 1], [], []>} : vector<8x192xf32>, vector<192x4xf32>, vector<8x4xf32> -> vector<8x4xf32>
    %19 = vector.broadcast %14 : vector<8x1xf32> to vector<8x4xf32>
    %20 = arith.mulf %18, %19 : vector<8x4xf32>
    %cst_21 = arith.constant dense<0.000000e+00> : vector<8x4xf32>
    %21 = tpu.matmul %13, %17, %cst_21 {dimension_numbers = #tpu.dot_dimension_numbers<[1], [0], [0], [1], [0, 0, 1, 1], [], []>} : vector<8x192xf32>, vector<192x4xf32>, vector<8x4xf32> -> vector<8x4xf32>
    %22 = vector.broadcast %14 : vector<8x1xf32> to vector<8x4xf32>
    %23 = arith.mulf %21, %22 : vector<8x4xf32>
    %24 = arith.mulf %20, %20 : vector<8x4xf32>
    %25 = arith.subf %23, %24 : vector<8x4xf32>
    %cst_22 = arith.constant 0.000000e+00 : f32
    %26 = vector.broadcast %cst_22 : f32 to vector<8x4xf32>
    %27 = arith.maximumf %25, %26 : vector<8x4xf32>
    %cst_23 = arith.constant dense<0.000000e+00> : vector<192x4xf32>
    %28 = tpu.matmul %12, %20, %cst_23 {dimension_numbers = #tpu.dot_dimension_numbers<[1], [0], [0], [1], [0, 0, 1, 1], [], []>} : vector<192x8xf32>, vector<8x4xf32>, vector<192x4xf32> -> vector<192x4xf32>
    %cst_24 = arith.constant dense<0.000000e+00> : vector<192x32xf32>
    %29 = tpu.matmul %28, %11, %cst_24 {dimension_numbers = #tpu.dot_dimension_numbers<[1], [0], [0], [1], [0, 0, 1, 1], [], []>} : vector<192x4xf32>, vector<4x32xf32>, vector<192x32xf32> -> vector<192x32xf32>
    %cst_25 = arith.constant dense<0.000000e+00> : vector<192x4xf32>
    %30 = tpu.matmul %12, %27, %cst_25 {dimension_numbers = #tpu.dot_dimension_numbers<[1], [0], [0], [1], [0, 0, 1, 1], [], []>} : vector<192x8xf32>, vector<8x4xf32>, vector<192x4xf32> -> vector<192x4xf32>
    %cst_26 = arith.constant dense<0.000000e+00> : vector<192x32xf32>
    %31 = tpu.matmul %30, %11, %cst_26 {dimension_numbers = #tpu.dot_dimension_numbers<[1], [0], [0], [1], [0, 0, 1, 1], [], []>} : vector<192x4xf32>, vector<4x32xf32>, vector<192x32xf32> -> vector<192x32xf32>
    %cst_27 = arith.constant dense<0.000000e+00> : vector<192xf32>
    %32 = vector.multi_reduction <add>, %12, %cst_27 [1] : vector<192x8xf32> to vector<192xf32>
    %33 = vector.shape_cast %32 : vector<192xf32> to vector<192x1xf32>
    %34 = arith.subf %9, %29 : vector<192x32xf32>
    %cst_28 = arith.constant 9.99999974E-6 : f32
    %35 = vector.broadcast %cst_28 : f32 to vector<192x32xf32>
    %36 = arith.addf %31, %35 : vector<192x32xf32>
    %37 = math.rsqrt %36 : vector<192x32xf32>
    %38 = arith.mulf %34, %37 : vector<192x32xf32>
    %c0_29 = arith.constant 0 : index
    %c0_30 = arith.constant 0 : index
    %c0_31 = arith.constant 0 : index
    %39 = vector.load %arg4[%c0_29, %c0_30, %c0_31] : memref<1x192x32xf32, #tpu.memory_space<vmem>>, vector<1x192x32xf32>
    %40 = vector.shape_cast %39 : vector<1x192x32xf32> to vector<192x32xf32>
    %41 = arith.mulf %38, %40 : vector<192x32xf32>
    %c0_32 = arith.constant 0 : index
    %c0_33 = arith.constant 0 : index
    %c0_34 = arith.constant 0 : index
    %42 = vector.load %arg5[%c0_32, %c0_33, %c0_34] : memref<1x192x32xf32, #tpu.memory_space<vmem>>, vector<1x192x32xf32>
    %43 = vector.shape_cast %42 : vector<1x192x32xf32> to vector<192x32xf32>
    %44 = arith.addf %41, %43 : vector<192x32xf32>
    %45 = vector.broadcast %33 : vector<192x1xf32> to vector<192x32xf32>
    %46 = arith.mulf %44, %45 : vector<192x32xf32>
    %c0_35 = arith.constant 0 : index
    %c0_36 = arith.constant 0 : index
    %c0_37 = arith.constant 0 : index
    %47 = vector.load %arg11[%c0_35, %c0_36, %c0_37] : memref<1x192x32xf32, #tpu.memory_space<vmem>>, vector<1x192x32xf32>
    %48 = vector.shape_cast %47 : vector<1x192x32xf32> to vector<192x32xf32>
    %49 = vector.shape_cast %46 : vector<192x32xf32> to vector<1x192x32xf32>
    tpu.vector_store %arg11[%c0_35, %c0_36, %c0_37], %49 {strides = array<i32>} : memref<1x192x32xf32, #tpu.memory_space<vmem>>, vector<1x192x32xf32>,
    return
  }
  func.func @transform_0(%arg0: i32) -> (i32, i32, i32) {
    %c0_i32 = arith.constant 0 : i32
    %c0_i32_0 = arith.constant 0 : i32
    %c0_i32_1 = arith.constant 0 : i32
    return %arg0, %c0_i32, %c0_i32_0 : i32, i32, i32
  }
  func.func @transform_1(%arg0: i32) -> (i32, i32, i32) {
    %c0_i32 = arith.constant 0 : i32
    %c0_i32_0 = arith.constant 0 : i32
    %c0_i32_1 = arith.constant 0 : i32
    return %arg0, %c0_i32, %c0_i32_0 : i32, i32, i32
  }
  func.func @transform_2(%arg0: i32) -> (i32, i32, i32) {
    %c0_i32 = arith.constant 0 : i32
    %c0_i32_0 = arith.constant 0 : i32
    %c0_i32_1 = arith.constant 0 : i32
    return %arg0, %c0_i32, %c0_i32_0 : i32, i32, i32
  }
  func.func @transform_3(%arg0: i32) -> (i32, i32, i32) {
    %c0_i32 = arith.constant 0 : i32
    %c0_i32_0 = arith.constant 0 : i32
    %c0_i32_1 = arith.constant 0 : i32
    return %arg0, %c0_i32, %c0_i32_0 : i32, i32, i32
  }
  func.func @transform_4(%arg0: i32) -> (i32, i32, i32) {
    %c0_i32 = arith.constant 0 : i32
    %c0_i32_0 = arith.constant 0 : i32
    %c0_i32_1 = arith.constant 0 : i32
    return %arg0, %c0_i32, %c0_i32_0 : i32, i32, i32
  }
  func.func @transform_5(%arg0: i32) -> (i32, i32) {
    %c0_i32 = arith.constant 0 : i32
    %c0_i32_0 = arith.constant 0 : i32
    %c0_i32_1 = arith.constant 0 : i32
    return %c0_i32, %c0_i32_0 : i32, i32
  }
  func.func @transform_6(%arg0: i32) -> (i32, i32) {
    %c0_i32 = arith.constant 0 : i32
    %c0_i32_0 = arith.constant 0 : i32
    %c0_i32_1 = arith.constant 0 : i32
    return %c0_i32, %c0_i32_0 : i32, i32
  }
  func.func @transform_7(%arg0: i32) -> (i32, i32) {
    %c0_i32 = arith.constant 0 : i32
    %c0_i32_0 = arith.constant 0 : i32
    %c0_i32_1 = arith.constant 0 : i32
    return %c0_i32, %c0_i32_0 : i32, i32
  }
  func.func @transform_8(%arg0: i32) -> (i32, i32) {
    %c0_i32 = arith.constant 0 : i32
    %c0_i32_0 = arith.constant 0 : i32
    %c0_i32_1 = arith.constant 0 : i32
    return %c0_i32, %c0_i32_0 : i32, i32
  }
  func.func @transform_9(%arg0: i32) -> (i32, i32) {
    %c0_i32 = arith.constant 0 : i32
    %c0_i32_0 = arith.constant 0 : i32
    %c0_i32_1 = arith.constant 0 : i32
    return %c0_i32, %c0_i32_0 : i32, i32
  }
  func.func @transform_10(%arg0: i32) -> (i32, i32, i32) {
    %c0_i32 = arith.constant 0 : i32
    %c0_i32_0 = arith.constant 0 : i32
    %c0_i32_1 = arith.constant 0 : i32
    return %arg0, %c0_i32, %c0_i32_0 : i32, i32, i32
  }
}

module attributes {stable_mosaic.version = 11 : i64} {
  func.func @_attn_tail_kernel(%arg0: i32, %arg1: memref<1x4x64x96xbf16, #tpu.memory_space<vmem>>, %arg2: memref<1x4x64x96xbf16, #tpu.memory_space<vmem>>, %arg3: memref<1x96x32xf32, #tpu.memory_space<vmem>>, %arg4: memref<1x96x32xf32, #tpu.memory_space<vmem>>, %arg5: memref<1x64x32xf32, #tpu.memory_space<vmem>>, %arg6: memref<2x32x32xf32, #tpu.memory_space<vmem>>, %arg7: memref<2x1x32xf32, #tpu.memory_space<vmem>>, %arg8: memref<2x32x32xf32, #tpu.memory_space<vmem>>, %arg9: memref<2x1x32xf32, #tpu.memory_space<vmem>>, %arg10: memref<4x1x32xf32, #tpu.memory_space<vmem>>, %arg11: memref<6x1x32xf32, #tpu.memory_space<vmem>>, %arg12: memref<32x16xf32, #tpu.memory_space<vmem>>, %arg13: memref<1x16xf32, #tpu.memory_space<vmem>>, %arg14: memref<1x64x112xf32, #tpu.memory_space<vmem>>) attributes {dimension_semantics = [#tpu.dimension_semantics<parallel>], iteration_bounds = array<i64: 2>, scalar_prefetch = 0 : i64, scratch_operands = 0 : i64, tpu.core_type = #tpu.core_type<tc>, window_params = [{transform_indices = @transform_0, window_bounds = array<i64: 1, 4, 64, 96>}, {transform_indices = @transform_1, window_bounds = array<i64: 1, 4, 64, 96>}, {transform_indices = @transform_2, window_bounds = array<i64: 1, 96, 32>}, {transform_indices = @transform_3, window_bounds = array<i64: 1, 96, 32>}, {transform_indices = @transform_4, window_bounds = array<i64: 1, 64, 32>}, {pipeline_mode = #tpu.pipeline_mode<synchronous>, transform_indices = @transform_5, window_bounds = array<i64: 2, 32, 32>}, {pipeline_mode = #tpu.pipeline_mode<synchronous>, transform_indices = @transform_6, window_bounds = array<i64: 2, 1, 32>}, {pipeline_mode = #tpu.pipeline_mode<synchronous>, transform_indices = @transform_7, window_bounds = array<i64: 2, 32, 32>}, {pipeline_mode = #tpu.pipeline_mode<synchronous>, transform_indices = @transform_8, window_bounds = array<i64: 2, 1, 32>}, {pipeline_mode = #tpu.pipeline_mode<synchronous>, transform_indices = @transform_9, window_bounds = array<i64: 4, 1, 32>}, {pipeline_mode = #tpu.pipeline_mode<synchronous>, transform_indices = @transform_10, window_bounds = array<i64: 6, 1, 32>}, {pipeline_mode = #tpu.pipeline_mode<synchronous>, transform_indices = @transform_11, window_bounds = array<i64: 32, 16>}, {pipeline_mode = #tpu.pipeline_mode<synchronous>, transform_indices = @transform_12, window_bounds = array<i64: 1, 16>}, {transform_indices = @transform_13, window_bounds = array<i64: 1, 64, 112>}]} {
    %c0 = arith.constant 0 : index
    %c0_0 = arith.constant 0 : index
    %c0_1 = arith.constant 0 : index
    %0 = vector.load %arg5[%c0, %c0_0, %c0_1] : memref<1x64x32xf32, #tpu.memory_space<vmem>>, vector<1x64x32xf32>
    %1 = vector.shape_cast %0 : vector<1x64x32xf32> to vector<64x32xf32>
    %c0_2 = arith.constant 0 : index
    %c0_3 = arith.constant 0 : index
    %c0_4 = arith.constant 0 : index
    %2 = vector.load %arg3[%c0_2, %c0_3, %c0_4] : memref<1x96x32xf32, #tpu.memory_space<vmem>>, vector<1x96x32xf32>
    %3 = vector.shape_cast %2 : vector<1x96x32xf32> to vector<96x32xf32>
    %4 = arith.truncf %3 : vector<96x32xf32> to vector<96x32xbf16>
    %c0_5 = arith.constant 0 : index
    %c0_6 = arith.constant 0 : index
    %c0_7 = arith.constant 0 : index
    %5 = vector.load %arg6[%c0_5, %c0_6, %c0_7] : memref<2x32x32xf32, #tpu.memory_space<vmem>>, vector<1x32x32xf32>
    %6 = vector.shape_cast %5 : vector<1x32x32xf32> to vector<32x32xf32>
    %7 = arith.truncf %6 : vector<32x32xf32> to vector<32x32xbf16>
    %cst = arith.constant dense<0.000000e+00> : vector<96x32xf32>
    %8 = tpu.matmul %4, %7, %cst {dimension_numbers = #tpu.dot_dimension_numbers<[1], [0], [0], [1], [0, 0, 1, 1], [], []>} : vector<96x32xbf16>, vector<32x32xbf16>, vector<96x32xf32> -> vector<96x32xf32>
    %c0_8 = arith.constant 0 : index
    %c0_9 = arith.constant 0 : index
    %c0_10 = arith.constant 0 : index
    %9 = vector.load %arg7[%c0_8, %c0_9, %c0_10] : memref<2x1x32xf32, #tpu.memory_space<vmem>>, vector<1x1x32xf32>
    %10 = vector.shape_cast %9 : vector<1x1x32xf32> to vector<1x32xf32>
    %11 = vector.broadcast %10 : vector<1x32xf32> to vector<96x32xf32>
    %12 = arith.addf %8, %11 : vector<96x32xf32>
    %cst_11 = arith.constant 0.000000e+00 : f32
    %13 = vector.broadcast %cst_11 : f32 to vector<64x32xf32>
    %c0_12 = arith.constant 0 : index
    %c0_13 = arith.constant 0 : index
    %c0_14 = arith.constant 0 : index
    %14 = vector.load %arg10[%c0_12, %c0_13, %c0_14] : memref<4x1x32xf32, #tpu.memory_space<vmem>>, vector<1x1x32xf32>
    %15 = vector.shape_cast %14 : vector<1x1x32xf32> to vector<1x32xf32>
    %16 = vector.broadcast %15 : vector<1x32xf32> to vector<96x32xf32>
    %17 = arith.mulf %12, %16 : vector<96x32xf32>
    %18 = arith.truncf %17 : vector<96x32xf32> to vector<96x32xbf16>
    %c0_15 = arith.constant 0 : index
    %c0_16 = arith.constant 0 : index
    %c0_17 = arith.constant 0 : index
    %c0_18 = arith.constant 0 : index
    %19 = vector.load %arg1[%c0_15, %c0_16, %c0_17, %c0_18] : memref<1x4x64x96xbf16, #tpu.memory_space<vmem>>, vector<1x1x64x96xbf16>
    %20 = vector.shape_cast %19 : vector<1x1x64x96xbf16> to vector<64x96xbf16>
    %cst_19 = arith.constant dense<0.000000e+00> : vector<64x32xf32>
    %21 = tpu.matmul %20, %18, %cst_19 {dimension_numbers = #tpu.dot_dimension_numbers<[1], [0], [0], [1], [0, 0, 1, 1], [], []>} : vector<64x96xbf16>, vector<96x32xbf16>, vector<64x32xf32> -> vector<64x32xf32>
    %22 = arith.addf %13, %21 : vector<64x32xf32>
    %c1 = arith.constant 1 : index
    %c0_20 = arith.constant 0 : index
    %c0_21 = arith.constant 0 : index
    %23 = vector.load %arg10[%c1, %c0_20, %c0_21] : memref<4x1x32xf32, #tpu.memory_space<vmem>>, vector<1x1x32xf32>
    %24 = vector.shape_cast %23 : vector<1x1x32xf32> to vector<1x32xf32>
    %25 = vector.broadcast %24 : vector<1x32xf32> to vector<96x32xf32>
    %26 = arith.mulf %12, %25 : vector<96x32xf32>
    %27 = arith.truncf %26 : vector<96x32xf32> to vector<96x32xbf16>
    %c0_22 = arith.constant 0 : index
    %c1_23 = arith.constant 1 : index
    %c0_24 = arith.constant 0 : index
    %c0_25 = arith.constant 0 : index
    %28 = vector.load %arg1[%c0_22, %c1_23, %c0_24, %c0_25] : memref<1x4x64x96xbf16, #tpu.memory_space<vmem>>, vector<1x1x64x96xbf16>
    %29 = vector.shape_cast %28 : vector<1x1x64x96xbf16> to vector<64x96xbf16>
    %cst_26 = arith.constant dense<0.000000e+00> : vector<64x32xf32>
    %30 = tpu.matmul %29, %27, %cst_26 {dimension_numbers = #tpu.dot_dimension_numbers<[1], [0], [0], [1], [0, 0, 1, 1], [], []>} : vector<64x96xbf16>, vector<96x32xbf16>, vector<64x32xf32> -> vector<64x32xf32>
    %31 = arith.addf %22, %30 : vector<64x32xf32>
    %c2 = arith.constant 2 : index
    %c0_27 = arith.constant 0 : index
    %c0_28 = arith.constant 0 : index
    %32 = vector.load %arg10[%c2, %c0_27, %c0_28] : memref<4x1x32xf32, #tpu.memory_space<vmem>>, vector<1x1x32xf32>
    %33 = vector.shape_cast %32 : vector<1x1x32xf32> to vector<1x32xf32>
    %34 = vector.broadcast %33 : vector<1x32xf32> to vector<96x32xf32>
    %35 = arith.mulf %12, %34 : vector<96x32xf32>
    %36 = arith.truncf %35 : vector<96x32xf32> to vector<96x32xbf16>
    %c0_29 = arith.constant 0 : index
    %c2_30 = arith.constant 2 : index
    %c0_31 = arith.constant 0 : index
    %c0_32 = arith.constant 0 : index
    %37 = vector.load %arg1[%c0_29, %c2_30, %c0_31, %c0_32] : memref<1x4x64x96xbf16, #tpu.memory_space<vmem>>, vector<1x1x64x96xbf16>
    %38 = vector.shape_cast %37 : vector<1x1x64x96xbf16> to vector<64x96xbf16>
    %cst_33 = arith.constant dense<0.000000e+00> : vector<64x32xf32>
    %39 = tpu.matmul %38, %36, %cst_33 {dimension_numbers = #tpu.dot_dimension_numbers<[1], [0], [0], [1], [0, 0, 1, 1], [], []>} : vector<64x96xbf16>, vector<96x32xbf16>, vector<64x32xf32> -> vector<64x32xf32>
    %40 = arith.addf %31, %39 : vector<64x32xf32>
    %c3 = arith.constant 3 : index
    %c0_34 = arith.constant 0 : index
    %c0_35 = arith.constant 0 : index
    %41 = vector.load %arg10[%c3, %c0_34, %c0_35] : memref<4x1x32xf32, #tpu.memory_space<vmem>>, vector<1x1x32xf32>
    %42 = vector.shape_cast %41 : vector<1x1x32xf32> to vector<1x32xf32>
    %43 = vector.broadcast %42 : vector<1x32xf32> to vector<96x32xf32>
    %44 = arith.mulf %12, %43 : vector<96x32xf32>
    %45 = arith.truncf %44 : vector<96x32xf32> to vector<96x32xbf16>
    %c0_36 = arith.constant 0 : index
    %c3_37 = arith.constant 3 : index
    %c0_38 = arith.constant 0 : index
    %c0_39 = arith.constant 0 : index
    %46 = vector.load %arg1[%c0_36, %c3_37, %c0_38, %c0_39] : memref<1x4x64x96xbf16, #tpu.memory_space<vmem>>, vector<1x1x64x96xbf16>
    %47 = vector.shape_cast %46 : vector<1x1x64x96xbf16> to vector<64x96xbf16>
    %cst_40 = arith.constant dense<0.000000e+00> : vector<64x32xf32>
    %48 = tpu.matmul %47, %45, %cst_40 {dimension_numbers = #tpu.dot_dimension_numbers<[1], [0], [0], [1], [0, 0, 1, 1], [], []>} : vector<64x96xbf16>, vector<96x32xbf16>, vector<64x32xf32> -> vector<64x32xf32>
    %49 = arith.addf %40, %48 : vector<64x32xf32>
    %50 = arith.truncf %49 : vector<64x32xf32> to vector<64x32xbf16>
    %c0_41 = arith.constant 0 : index
    %c0_42 = arith.constant 0 : index
    %c0_43 = arith.constant 0 : index
    %51 = vector.load %arg8[%c0_41, %c0_42, %c0_43] : memref<2x32x32xf32, #tpu.memory_space<vmem>>, vector<1x32x32xf32>
    %52 = vector.shape_cast %51 : vector<1x32x32xf32> to vector<32x32xf32>
    %53 = arith.truncf %52 : vector<32x32xf32> to vector<32x32xbf16>
    %cst_44 = arith.constant dense<0.000000e+00> : vector<64x32xf32>
    %54 = tpu.matmul %50, %53, %cst_44 {dimension_numbers = #tpu.dot_dimension_numbers<[1], [0], [0], [1], [0, 0, 1, 1], [], []>} : vector<64x32xbf16>, vector<32x32xbf16>, vector<64x32xf32> -> vector<64x32xf32>
    %c0_45 = arith.constant 0 : index
    %c0_46 = arith.constant 0 : index
    %c0_47 = arith.constant 0 : index
    %55 = vector.load %arg9[%c0_45, %c0_46, %c0_47] : memref<2x1x32xf32, #tpu.memory_space<vmem>>, vector<1x1x32xf32>
    %56 = vector.shape_cast %55 : vector<1x1x32xf32> to vector<1x32xf32>
    %57 = vector.broadcast %56 : vector<1x32xf32> to vector<64x32xf32>
    %58 = arith.addf %54, %57 : vector<64x32xf32>
    %59 = arith.addf %58, %1 : vector<64x32xf32>
    %c0_48 = arith.constant 0 : index
    %c0_49 = arith.constant 0 : index
    %c0_50 = arith.constant 0 : index
    %60 = vector.load %arg4[%c0_48, %c0_49, %c0_50] : memref<1x96x32xf32, #tpu.memory_space<vmem>>, vector<1x96x32xf32>
    %61 = vector.shape_cast %60 : vector<1x96x32xf32> to vector<96x32xf32>
    %62 = arith.truncf %61 : vector<96x32xf32> to vector<96x32xbf16>
    %c1_51 = arith.constant 1 : index
    %c0_52 = arith.constant 0 : index
    %c0_53 = arith.constant 0 : index
    %63 = vector.load %arg6[%c1_51, %c0_52, %c0_53] : memref<2x32x32xf32, #tpu.memory_space<vmem>>, vector<1x32x32xf32>
    %64 = vector.shape_cast %63 : vector<1x32x32xf32> to vector<32x32xf32>
    %65 = arith.truncf %64 : vector<32x32xf32> to vector<32x32xbf16>
    %cst_54 = arith.constant dense<0.000000e+00> : vector<96x32xf32>
    %66 = tpu.matmul %62, %65, %cst_54 {dimension_numbers = #tpu.dot_dimension_numbers<[1], [0], [0], [1], [0, 0, 1, 1], [], []>} : vector<96x32xbf16>, vector<32x32xbf16>, vector<96x32xf32> -> vector<96x32xf32>
    %c1_55 = arith.constant 1 : index
    %c0_56 = arith.constant 0 : index
    %c0_57 = arith.constant 0 : index
    %67 = vector.load %arg7[%c1_55, %c0_56, %c0_57] : memref<2x1x32xf32, #tpu.memory_space<vmem>>, vector<1x1x32xf32>
    %68 = vector.shape_cast %67 : vector<1x1x32xf32> to vector<1x32xf32>
    %69 = vector.broadcast %68 : vector<1x32xf32> to vector<96x32xf32>
    %70 = arith.addf %66, %69 : vector<96x32xf32>
    %cst_58 = arith.constant 0.000000e+00 : f32
    %71 = vector.broadcast %cst_58 : f32 to vector<64x32xf32>
    %c0_59 = arith.constant 0 : index
    %c0_60 = arith.constant 0 : index
    %c0_61 = arith.constant 0 : index
    %72 = vector.load %arg10[%c0_59, %c0_60, %c0_61] : memref<4x1x32xf32, #tpu.memory_space<vmem>>, vector<1x1x32xf32>
    %73 = vector.shape_cast %72 : vector<1x1x32xf32> to vector<1x32xf32>
    %74 = vector.broadcast %73 : vector<1x32xf32> to vector<96x32xf32>
    %75 = arith.mulf %70, %74 : vector<96x32xf32>
    %76 = arith.truncf %75 : vector<96x32xf32> to vector<96x32xbf16>
    %c0_62 = arith.constant 0 : index
    %c0_63 = arith.constant 0 : index
    %c0_64 = arith.constant 0 : index
    %c0_65 = arith.constant 0 : index
    %77 = vector.load %arg2[%c0_62, %c0_63, %c0_64, %c0_65] : memref<1x4x64x96xbf16, #tpu.memory_space<vmem>>, vector<1x1x64x96xbf16>
    %78 = vector.shape_cast %77 : vector<1x1x64x96xbf16> to vector<64x96xbf16>
    %cst_66 = arith.constant dense<0.000000e+00> : vector<64x32xf32>
    %79 = tpu.matmul %78, %76, %cst_66 {dimension_numbers = #tpu.dot_dimension_numbers<[1], [0], [0], [1], [0, 0, 1, 1], [], []>} : vector<64x96xbf16>, vector<96x32xbf16>, vector<64x32xf32> -> vector<64x32xf32>
    %80 = arith.addf %71, %79 : vector<64x32xf32>
    %c1_67 = arith.constant 1 : index
    %c0_68 = arith.constant 0 : index
    %c0_69 = arith.constant 0 : index
    %81 = vector.load %arg10[%c1_67, %c0_68, %c0_69] : memref<4x1x32xf32, #tpu.memory_space<vmem>>, vector<1x1x32xf32>
    %82 = vector.shape_cast %81 : vector<1x1x32xf32> to vector<1x32xf32>
    %83 = vector.broadcast %82 : vector<1x32xf32> to vector<96x32xf32>
    %84 = arith.mulf %70, %83 : vector<96x32xf32>
    %85 = arith.truncf %84 : vector<96x32xf32> to vector<96x32xbf16>
    %c0_70 = arith.constant 0 : index
    %c1_71 = arith.constant 1 : index
    %c0_72 = arith.constant 0 : index
    %c0_73 = arith.constant 0 : index
    %86 = vector.load %arg2[%c0_70, %c1_71, %c0_72, %c0_73] : memref<1x4x64x96xbf16, #tpu.memory_space<vmem>>, vector<1x1x64x96xbf16>
    %87 = vector.shape_cast %86 : vector<1x1x64x96xbf16> to vector<64x96xbf16>
    %cst_74 = arith.constant dense<0.000000e+00> : vector<64x32xf32>
    %88 = tpu.matmul %87, %85, %cst_74 {dimension_numbers = #tpu.dot_dimension_numbers<[1], [0], [0], [1], [0, 0, 1, 1], [], []>} : vector<64x96xbf16>, vector<96x32xbf16>, vector<64x32xf32> -> vector<64x32xf32>
    %89 = arith.addf %80, %88 : vector<64x32xf32>
    %c2_75 = arith.constant 2 : index
    %c0_76 = arith.constant 0 : index
    %c0_77 = arith.constant 0 : index
    %90 = vector.load %arg10[%c2_75, %c0_76, %c0_77] : memref<4x1x32xf32, #tpu.memory_space<vmem>>, vector<1x1x32xf32>
    %91 = vector.shape_cast %90 : vector<1x1x32xf32> to vector<1x32xf32>
    %92 = vector.broadcast %91 : vector<1x32xf32> to vector<96x32xf32>
    %93 = arith.mulf %70, %92 : vector<96x32xf32>
    %94 = arith.truncf %93 : vector<96x32xf32> to vector<96x32xbf16>
    %c0_78 = arith.constant 0 : index
    %c2_79 = arith.constant 2 : index
    %c0_80 = arith.constant 0 : index
    %c0_81 = arith.constant 0 : index
    %95 = vector.load %arg2[%c0_78, %c2_79, %c0_80, %c0_81] : memref<1x4x64x96xbf16, #tpu.memory_space<vmem>>, vector<1x1x64x96xbf16>
    %96 = vector.shape_cast %95 : vector<1x1x64x96xbf16> to vector<64x96xbf16>
    %cst_82 = arith.constant dense<0.000000e+00> : vector<64x32xf32>
    %97 = tpu.matmul %96, %94, %cst_82 {dimension_numbers = #tpu.dot_dimension_numbers<[1], [0], [0], [1], [0, 0, 1, 1], [], []>} : vector<64x96xbf16>, vector<96x32xbf16>, vector<64x32xf32> -> vector<64x32xf32>
    %98 = arith.addf %89, %97 : vector<64x32xf32>
    %c3_83 = arith.constant 3 : index
    %c0_84 = arith.constant 0 : index
    %c0_85 = arith.constant 0 : index
    %99 = vector.load %arg10[%c3_83, %c0_84, %c0_85] : memref<4x1x32xf32, #tpu.memory_space<vmem>>, vector<1x1x32xf32>
    %100 = vector.shape_cast %99 : vector<1x1x32xf32> to vector<1x32xf32>
    %101 = vector.broadcast %100 : vector<1x32xf32> to vector<96x32xf32>
    %102 = arith.mulf %70, %101 : vector<96x32xf32>
    %103 = arith.truncf %102 : vector<96x32xf32> to vector<96x32xbf16>
    %c0_86 = arith.constant 0 : index
    %c3_87 = arith.constant 3 : index
    %c0_88 = arith.constant 0 : index
    %c0_89 = arith.constant 0 : index
    %104 = vector.load %arg2[%c0_86, %c3_87, %c0_88, %c0_89] : memref<1x4x64x96xbf16, #tpu.memory_space<vmem>>, vector<1x1x64x96xbf16>
    %105 = vector.shape_cast %104 : vector<1x1x64x96xbf16> to vector<64x96xbf16>
    %cst_90 = arith.constant dense<0.000000e+00> : vector<64x32xf32>
    %106 = tpu.matmul %105, %103, %cst_90 {dimension_numbers = #tpu.dot_dimension_numbers<[1], [0], [0], [1], [0, 0, 1, 1], [], []>} : vector<64x96xbf16>, vector<96x32xbf16>, vector<64x32xf32> -> vector<64x32xf32>
    %107 = arith.addf %98, %106 : vector<64x32xf32>
    %108 = arith.truncf %107 : vector<64x32xf32> to vector<64x32xbf16>
    %c1_91 = arith.constant 1 : index
    %c0_92 = arith.constant 0 : index
    %c0_93 = arith.constant 0 : index
    %109 = vector.load %arg8[%c1_91, %c0_92, %c0_93] : memref<2x32x32xf32, #tpu.memory_space<vmem>>, vector<1x32x32xf32>
    %110 = vector.shape_cast %109 : vector<1x32x32xf32> to vector<32x32xf32>
    %111 = arith.truncf %110 : vector<32x32xf32> to vector<32x32xbf16>
    %cst_94 = arith.constant dense<0.000000e+00> : vector<64x32xf32>
    %112 = tpu.matmul %108, %111, %cst_94 {dimension_numbers = #tpu.dot_dimension_numbers<[1], [0], [0], [1], [0, 0, 1, 1], [], []>} : vector<64x32xbf16>, vector<32x32xbf16>, vector<64x32xf32> -> vector<64x32xf32>
    %c1_95 = arith.constant 1 : index
    %c0_96 = arith.constant 0 : index
    %c0_97 = arith.constant 0 : index
    %113 = vector.load %arg9[%c1_95, %c0_96, %c0_97] : memref<2x1x32xf32, #tpu.memory_space<vmem>>, vector<1x1x32xf32>
    %114 = vector.shape_cast %113 : vector<1x1x32xf32> to vector<1x32xf32>
    %115 = vector.broadcast %114 : vector<1x32xf32> to vector<64x32xf32>
    %116 = arith.addf %112, %115 : vector<64x32xf32>
    %117 = arith.addf %116, %1 : vector<64x32xf32>
    %cst_98 = arith.constant 5.000000e-01 : f32
    %118 = vector.broadcast %cst_98 : f32 to vector<64x32xf32>
    %119 = arith.mulf %118, %59 : vector<64x32xf32>
    %cst_99 = arith.constant 5.000000e-01 : f32
    %120 = vector.broadcast %cst_99 : f32 to vector<64x32xf32>
    %121 = arith.mulf %120, %117 : vector<64x32xf32>
    %122 = arith.addf %119, %121 : vector<64x32xf32>
    %123 = arith.addf %122, %1 : vector<64x32xf32>
    %c0_100 = arith.constant 0 : index
    %c0_101 = arith.constant 0 : index
    %c0_102 = arith.constant 0 : index
    %124 = vector.load %arg11[%c0_100, %c0_101, %c0_102] : memref<6x1x32xf32, #tpu.memory_space<vmem>>, vector<1x1x32xf32>
    %125 = vector.shape_cast %124 : vector<1x1x32xf32> to vector<1x32xf32>
    %c1_103 = arith.constant 1 : index
    %c0_104 = arith.constant 0 : index
    %c0_105 = arith.constant 0 : index
    %126 = vector.load %arg11[%c1_103, %c0_104, %c0_105] : memref<6x1x32xf32, #tpu.memory_space<vmem>>, vector<1x1x32xf32>
    %127 = vector.shape_cast %126 : vector<1x1x32xf32> to vector<1x32xf32>
    %cst_106 = arith.constant dense<0.000000e+00> : vector<64xf32>
    %128 = vector.multi_reduction <add>, %123, %cst_106 [1] : vector<64x32xf32> to vector<64xf32>
    %129 = vector.shape_cast %128 : vector<64xf32> to vector<64x1xf32>
    %cst_107 = arith.constant 3.200000e+01 : f32
    %130 = vector.broadcast %cst_107 : f32 to vector<64x1xf32>
    %131 = arith.divf %129, %130 : vector<64x1xf32>
    %132 = vector.broadcast %131 : vector<64x1xf32> to vector<64x32xf32>
    %133 = arith.subf %123, %132 : vector<64x32xf32>
    %134 = arith.mulf %133, %133 : vector<64x32xf32>
    %cst_108 = arith.constant dense<0.000000e+00> : vector<64xf32>
    %135 = vector.multi_reduction <add>, %134, %cst_108 [1] : vector<64x32xf32> to vector<64xf32>
    %136 = vector.shape_cast %135 : vector<64xf32> to vector<64x1xf32>
    %cst_109 = arith.constant 3.200000e+01 : f32
    %137 = vector.broadcast %cst_109 : f32 to vector<64x1xf32>
    %138 = arith.divf %136, %137 : vector<64x1xf32>
    %139 = vector.broadcast %131 : vector<64x1xf32> to vector<64x32xf32>
    %140 = arith.subf %123, %139 : vector<64x32xf32>
    %cst_110 = arith.constant 9.99999974E-6 : f32
    %141 = vector.broadcast %cst_110 : f32 to vector<64x1xf32>
    %142 = arith.addf %138, %141 : vector<64x1xf32>
    %143 = math.rsqrt %142 : vector<64x1xf32>
    %144 = vector.broadcast %143 : vector<64x1xf32> to vector<64x32xf32>
    %145 = arith.mulf %140, %144 : vector<64x32xf32>
    %146 = vector.broadcast %125 : vector<1x32xf32> to vector<64x32xf32>
    %147 = arith.mulf %145, %146 : vector<64x32xf32>
    %148 = vector.broadcast %127 : vector<1x32xf32> to vector<64x32xf32>
    %149 = arith.addf %147, %148 : vector<64x32xf32>
    %150 = arith.addf %59, %1 : vector<64x32xf32>
    %c2_111 = arith.constant 2 : index
    %c0_112 = arith.constant 0 : index
    %c0_113 = arith.constant 0 : index
    %151 = vector.load %arg11[%c2_111, %c0_112, %c0_113] : memref<6x1x32xf32, #tpu.memory_space<vmem>>, vector<1x1x32xf32>
    %152 = vector.shape_cast %151 : vector<1x1x32xf32> to vector<1x32xf32>
    %c3_114 = arith.constant 3 : index
    %c0_115 = arith.constant 0 : index
    %c0_116 = arith.constant 0 : index
    %153 = vector.load %arg11[%c3_114, %c0_115, %c0_116] : memref<6x1x32xf32, #tpu.memory_space<vmem>>, vector<1x1x32xf32>
    %154 = vector.shape_cast %153 : vector<1x1x32xf32> to vector<1x32xf32>
    %cst_117 = arith.constant dense<0.000000e+00> : vector<64xf32>
    %155 = vector.multi_reduction <add>, %150, %cst_117 [1] : vector<64x32xf32> to vector<64xf32>
    %156 = vector.shape_cast %155 : vector<64xf32> to vector<64x1xf32>
    %cst_118 = arith.constant 3.200000e+01 : f32
    %157 = vector.broadcast %cst_118 : f32 to vector<64x1xf32>
    %158 = arith.divf %156, %157 : vector<64x1xf32>
    %159 = vector.broadcast %158 : vector<64x1xf32> to vector<64x32xf32>
    %160 = arith.subf %150, %159 : vector<64x32xf32>
    %161 = arith.mulf %160, %160 : vector<64x32xf32>
    %cst_119 = arith.constant dense<0.000000e+00> : vector<64xf32>
    %162 = vector.multi_reduction <add>, %161, %cst_119 [1] : vector<64x32xf32> to vector<64xf32>
    %163 = vector.shape_cast %162 : vector<64xf32> to vector<64x1xf32>
    %cst_120 = arith.constant 3.200000e+01 : f32
    %164 = vector.broadcast %cst_120 : f32 to vector<64x1xf32>
    %165 = arith.divf %163, %164 : vector<64x1xf32>
    %166 = vector.broadcast %158 : vector<64x1xf32> to vector<64x32xf32>
    %167 = arith.subf %150, %166 : vector<64x32xf32>
    %cst_121 = arith.constant 9.99999974E-6 : f32
    %168 = vector.broadcast %cst_121 : f32 to vector<64x1xf32>
    %169 = arith.addf %165, %168 : vector<64x1xf32>
    %170 = math.rsqrt %169 : vector<64x1xf32>
    %171 = vector.broadcast %170 : vector<64x1xf32> to vector<64x32xf32>
    %172 = arith.mulf %167, %171 : vector<64x32xf32>
    %173 = vector.broadcast %152 : vector<1x32xf32> to vector<64x32xf32>
    %174 = arith.mulf %172, %173 : vector<64x32xf32>
    %175 = vector.broadcast %154 : vector<1x32xf32> to vector<64x32xf32>
    %176 = arith.addf %174, %175 : vector<64x32xf32>
    %177 = arith.addf %117, %1 : vector<64x32xf32>
    %c4 = arith.constant 4 : index
    %c0_122 = arith.constant 0 : index
    %c0_123 = arith.constant 0 : index
    %178 = vector.load %arg11[%c4, %c0_122, %c0_123] : memref<6x1x32xf32, #tpu.memory_space<vmem>>, vector<1x1x32xf32>
    %179 = vector.shape_cast %178 : vector<1x1x32xf32> to vector<1x32xf32>
    %c5 = arith.constant 5 : index
    %c0_124 = arith.constant 0 : index
    %c0_125 = arith.constant 0 : index
    %180 = vector.load %arg11[%c5, %c0_124, %c0_125] : memref<6x1x32xf32, #tpu.memory_space<vmem>>, vector<1x1x32xf32>
    %181 = vector.shape_cast %180 : vector<1x1x32xf32> to vector<1x32xf32>
    %cst_126 = arith.constant dense<0.000000e+00> : vector<64xf32>
    %182 = vector.multi_reduction <add>, %177, %cst_126 [1] : vector<64x32xf32> to vector<64xf32>
    %183 = vector.shape_cast %182 : vector<64xf32> to vector<64x1xf32>
    %cst_127 = arith.constant 3.200000e+01 : f32
    %184 = vector.broadcast %cst_127 : f32 to vector<64x1xf32>
    %185 = arith.divf %183, %184 : vector<64x1xf32>
    %186 = vector.broadcast %185 : vector<64x1xf32> to vector<64x32xf32>
    %187 = arith.subf %177, %186 : vector<64x32xf32>
    %188 = arith.mulf %187, %187 : vector<64x32xf32>
    %cst_128 = arith.constant dense<0.000000e+00> : vector<64xf32>
    %189 = vector.multi_reduction <add>, %188, %cst_128 [1] : vector<64x32xf32> to vector<64xf32>
    %190 = vector.shape_cast %189 : vector<64xf32> to vector<64x1xf32>
    %cst_129 = arith.constant 3.200000e+01 : f32
    %191 = vector.broadcast %cst_129 : f32 to vector<64x1xf32>
    %192 = arith.divf %190, %191 : vector<64x1xf32>
    %193 = vector.broadcast %185 : vector<64x1xf32> to vector<64x32xf32>
    %194 = arith.subf %177, %193 : vector<64x32xf32>
    %cst_130 = arith.constant 9.99999974E-6 : f32
    %195 = vector.broadcast %cst_130 : f32 to vector<64x1xf32>
    %196 = arith.addf %192, %195 : vector<64x1xf32>
    %197 = math.rsqrt %196 : vector<64x1xf32>
    %198 = vector.broadcast %197 : vector<64x1xf32> to vector<64x32xf32>
    %199 = arith.mulf %194, %198 : vector<64x32xf32>
    %200 = vector.broadcast %179 : vector<1x32xf32> to vector<64x32xf32>
    %201 = arith.mulf %199, %200 : vector<64x32xf32>
    %202 = vector.broadcast %181 : vector<1x32xf32> to vector<64x32xf32>
    %203 = arith.addf %201, %202 : vector<64x32xf32>
    %204 = arith.truncf %149 : vector<64x32xf32> to vector<64x32xbf16>
    %c0_131 = arith.constant 0 : index
    %c0_132 = arith.constant 0 : index
    %205 = vector.load %arg12[%c0_131, %c0_132] : memref<32x16xf32, #tpu.memory_space<vmem>>, vector<32x16xf32>
    %206 = arith.truncf %205 : vector<32x16xf32> to vector<32x16xbf16>
    %cst_133 = arith.constant dense<0.000000e+00> : vector<64x16xf32>
    %207 = tpu.matmul %204, %206, %cst_133 {dimension_numbers = #tpu.dot_dimension_numbers<[1], [0], [0], [1], [0, 0, 1, 1], [], []>} : vector<64x32xbf16>, vector<32x16xbf16>, vector<64x16xf32> -> vector<64x16xf32>
    %c0_134 = arith.constant 0 : index
    %c0_135 = arith.constant 0 : index
    %208 = vector.load %arg13[%c0_134, %c0_135] : memref<1x16xf32, #tpu.memory_space<vmem>>, vector<1x16xf32>
    %209 = vector.broadcast %208 : vector<1x16xf32> to vector<64x16xf32>
    %210 = arith.addf %207, %209 : vector<64x16xf32>
    %211 = tpu.concatenate %149, %176, %203, %210 in 1 : vector<64x32xf32>, vector<64x32xf32>, vector<64x32xf32>, vector<64x16xf32> -> vector<64x112xf32>
    %c0_136 = arith.constant 0 : index
    %c0_137 = arith.constant 0 : index
    %c0_138 = arith.constant 0 : index
    %212 = vector.load %arg14[%c0_136, %c0_137, %c0_138] : memref<1x64x112xf32, #tpu.memory_space<vmem>>, vector<1x64x112xf32>
    %213 = vector.shape_cast %212 : vector<1x64x112xf32> to vector<64x112xf32>
    %214 = vector.shape_cast %211 : vector<64x112xf32> to vector<1x64x112xf32>
    tpu.vector_store %arg14[%c0_136, %c0_137, %c0_138], %214 {strides = array<i32>} : memref<1x64x112xf32, #tpu.memory_space<vmem>>, vector<1x64x112xf32>,
    return
  }
  func.func @transform_0(%arg0: i32) -> (i32, i32, i32, i32) {
    %c0_i32 = arith.constant 0 : i32
    %c0_i32_0 = arith.constant 0 : i32
    %c0_i32_1 = arith.constant 0 : i32
    %c0_i32_2 = arith.constant 0 : i32
    return %arg0, %c0_i32, %c0_i32_0, %c0_i32_1 : i32, i32, i32, i32
  }
  func.func @transform_1(%arg0: i32) -> (i32, i32, i32, i32) {
    %c0_i32 = arith.constant 0 : i32
    %c0_i32_0 = arith.constant 0 : i32
    %c0_i32_1 = arith.constant 0 : i32
    %c0_i32_2 = arith.constant 0 : i32
    return %arg0, %c0_i32, %c0_i32_0, %c0_i32_1 : i32, i32, i32, i32
  }
  func.func @transform_2(%arg0: i32) -> (i32, i32, i32) {
    %c0_i32 = arith.constant 0 : i32
    %c0_i32_0 = arith.constant 0 : i32
    %c0_i32_1 = arith.constant 0 : i32
    return %arg0, %c0_i32, %c0_i32_0 : i32, i32, i32
  }
  func.func @transform_3(%arg0: i32) -> (i32, i32, i32) {
    %c0_i32 = arith.constant 0 : i32
    %c0_i32_0 = arith.constant 0 : i32
    %c0_i32_1 = arith.constant 0 : i32
    return %arg0, %c0_i32, %c0_i32_0 : i32, i32, i32
  }
  func.func @transform_4(%arg0: i32) -> (i32, i32, i32) {
    %c0_i32 = arith.constant 0 : i32
    %c0_i32_0 = arith.constant 0 : i32
    %c0_i32_1 = arith.constant 0 : i32
    return %arg0, %c0_i32, %c0_i32_0 : i32, i32, i32
  }
  func.func @transform_5(%arg0: i32) -> (i32, i32, i32) {
    %c0_i32 = arith.constant 0 : i32
    %c0_i32_0 = arith.constant 0 : i32
    %c0_i32_1 = arith.constant 0 : i32
    %c0_i32_2 = arith.constant 0 : i32
    return %c0_i32, %c0_i32_0, %c0_i32_1 : i32, i32, i32
  }
  func.func @transform_6(%arg0: i32) -> (i32, i32, i32) {
    %c0_i32 = arith.constant 0 : i32
    %c0_i32_0 = arith.constant 0 : i32
    %c0_i32_1 = arith.constant 0 : i32
    %c0_i32_2 = arith.constant 0 : i32
    return %c0_i32, %c0_i32_0, %c0_i32_1 : i32, i32, i32
  }
  func.func @transform_7(%arg0: i32) -> (i32, i32, i32) {
    %c0_i32 = arith.constant 0 : i32
    %c0_i32_0 = arith.constant 0 : i32
    %c0_i32_1 = arith.constant 0 : i32
    %c0_i32_2 = arith.constant 0 : i32
    return %c0_i32, %c0_i32_0, %c0_i32_1 : i32, i32, i32
  }
  func.func @transform_8(%arg0: i32) -> (i32, i32, i32) {
    %c0_i32 = arith.constant 0 : i32
    %c0_i32_0 = arith.constant 0 : i32
    %c0_i32_1 = arith.constant 0 : i32
    %c0_i32_2 = arith.constant 0 : i32
    return %c0_i32, %c0_i32_0, %c0_i32_1 : i32, i32, i32
  }
  func.func @transform_9(%arg0: i32) -> (i32, i32, i32) {
    %c0_i32 = arith.constant 0 : i32
    %c0_i32_0 = arith.constant 0 : i32
    %c0_i32_1 = arith.constant 0 : i32
    %c0_i32_2 = arith.constant 0 : i32
    return %c0_i32, %c0_i32_0, %c0_i32_1 : i32, i32, i32
  }
  func.func @transform_10(%arg0: i32) -> (i32, i32, i32) {
    %c0_i32 = arith.constant 0 : i32
    %c0_i32_0 = arith.constant 0 : i32
    %c0_i32_1 = arith.constant 0 : i32
    %c0_i32_2 = arith.constant 0 : i32
    return %c0_i32, %c0_i32_0, %c0_i32_1 : i32, i32, i32
  }
  func.func @transform_11(%arg0: i32) -> (i32, i32) {
    %c0_i32 = arith.constant 0 : i32
    %c0_i32_0 = arith.constant 0 : i32
    %c0_i32_1 = arith.constant 0 : i32
    return %c0_i32, %c0_i32_0 : i32, i32
  }
  func.func @transform_12(%arg0: i32) -> (i32, i32) {
    %c0_i32 = arith.constant 0 : i32
    %c0_i32_0 = arith.constant 0 : i32
    %c0_i32_1 = arith.constant 0 : i32
    return %c0_i32, %c0_i32_0 : i32, i32
  }
  func.func @transform_13(%arg0: i32) -> (i32, i32, i32) {
    %c0_i32 = arith.constant 0 : i32
    %c0_i32_0 = arith.constant 0 : i32
    %c0_i32_1 = arith.constant 0 : i32
    return %arg0, %c0_i32, %c0_i32_0 : i32, i32, i32
  }
}

module attributes {stable_mosaic.version = 11 : i64} {
  func.func @_linear_kernel(%arg0: memref<510x32xf32, #tpu.memory_space<vmem>>, %arg1: memref<32x384xf32, #tpu.memory_space<vmem>>, %arg2: memref<1x384xf32, #tpu.memory_space<vmem>>, %arg3: memref<510x384xf32, #tpu.memory_space<vmem>>) attributes {dimension_semantics = [], scalar_prefetch = 0 : i64, scratch_operands = 0 : i64, tpu.core_type = #tpu.core_type<tc>} {
    %c0 = arith.constant 0 : index
    %c0_0 = arith.constant 0 : index
    %0 = vector.load %arg0[%c0, %c0_0] : memref<510x32xf32, #tpu.memory_space<vmem>>, vector<510x32xf32>
    %1 = arith.truncf %0 : vector<510x32xf32> to vector<510x32xbf16>
    %c0_1 = arith.constant 0 : index
    %c0_2 = arith.constant 0 : index
    %2 = vector.load %arg1[%c0_1, %c0_2] : memref<32x384xf32, #tpu.memory_space<vmem>>, vector<32x384xf32>
    %3 = arith.truncf %2 : vector<32x384xf32> to vector<32x384xbf16>
    %cst = arith.constant dense<0.000000e+00> : vector<510x384xf32>
    %4 = tpu.matmul %1, %3, %cst {dimension_numbers = #tpu.dot_dimension_numbers<[1], [0], [0], [1], [0, 0, 1, 1], [], []>} : vector<510x32xbf16>, vector<32x384xbf16>, vector<510x384xf32> -> vector<510x384xf32>
    %c0_3 = arith.constant 0 : index
    %c0_4 = arith.constant 0 : index
    %5 = vector.load %arg2[%c0_3, %c0_4] : memref<1x384xf32, #tpu.memory_space<vmem>>, vector<1x384xf32>
    %6 = vector.broadcast %5 : vector<1x384xf32> to vector<510x384xf32>
    %7 = arith.addf %4, %6 : vector<510x384xf32>
    %c0_5 = arith.constant 0 : index
    %c0_6 = arith.constant 0 : index
    %8 = vector.load %arg3[%c0_5, %c0_6] : memref<510x384xf32, #tpu.memory_space<vmem>>, vector<510x384xf32>
    tpu.vector_store %arg3[%c0_5, %c0_6], %7 {strides = array<i32>} : memref<510x384xf32, #tpu.memory_space<vmem>>, vector<510x384xf32>,
    return
  }
}

module attributes {stable_mosaic.version = 11 : i64} {
  func.func @_linear_kernel(%arg0: memref<1536x32xf32, #tpu.memory_space<vmem>>, %arg1: memref<32x48xf32, #tpu.memory_space<vmem>>, %arg2: memref<1x48xf32, #tpu.memory_space<vmem>>, %arg3: memref<1536x48xf32, #tpu.memory_space<vmem>>) attributes {dimension_semantics = [], scalar_prefetch = 0 : i64, scratch_operands = 0 : i64, tpu.core_type = #tpu.core_type<tc>} {
    %c0 = arith.constant 0 : index
    %c0_0 = arith.constant 0 : index
    %0 = vector.load %arg0[%c0, %c0_0] : memref<1536x32xf32, #tpu.memory_space<vmem>>, vector<1536x32xf32>
    %1 = arith.truncf %0 : vector<1536x32xf32> to vector<1536x32xbf16>
    %c0_1 = arith.constant 0 : index
    %c0_2 = arith.constant 0 : index
    %2 = vector.load %arg1[%c0_1, %c0_2] : memref<32x48xf32, #tpu.memory_space<vmem>>, vector<32x48xf32>
    %3 = arith.truncf %2 : vector<32x48xf32> to vector<32x48xbf16>
    %cst = arith.constant dense<0.000000e+00> : vector<1536x48xf32>
    %4 = tpu.matmul %1, %3, %cst {dimension_numbers = #tpu.dot_dimension_numbers<[1], [0], [0], [1], [0, 0, 1, 1], [], []>} : vector<1536x32xbf16>, vector<32x48xbf16>, vector<1536x48xf32> -> vector<1536x48xf32>
    %c0_3 = arith.constant 0 : index
    %c0_4 = arith.constant 0 : index
    %5 = vector.load %arg2[%c0_3, %c0_4] : memref<1x48xf32, #tpu.memory_space<vmem>>, vector<1x48xf32>
    %6 = vector.broadcast %5 : vector<1x48xf32> to vector<1536x48xf32>
    %7 = arith.addf %4, %6 : vector<1536x48xf32>
    %c0_5 = arith.constant 0 : index
    %c0_6 = arith.constant 0 : index
    %8 = vector.load %arg3[%c0_5, %c0_6] : memref<1536x48xf32, #tpu.memory_space<vmem>>, vector<1536x48xf32>
    tpu.vector_store %arg3[%c0_5, %c0_6], %7 {strides = array<i32>} : memref<1536x48xf32, #tpu.memory_space<vmem>>, vector<1536x48xf32>,
    return
  }
}

module attributes {stable_mosaic.version = 11 : i64} {
  func.func @_linear_kernel(%arg0: memref<512x16xf32, #tpu.memory_space<vmem>>, %arg1: memref<16x3xf32, #tpu.memory_space<vmem>>, %arg2: memref<1x3xf32, #tpu.memory_space<vmem>>, %arg3: memref<512x3xf32, #tpu.memory_space<vmem>>) attributes {dimension_semantics = [], scalar_prefetch = 0 : i64, scratch_operands = 0 : i64, tpu.core_type = #tpu.core_type<tc>} {
    %c0 = arith.constant 0 : index
    %c0_0 = arith.constant 0 : index
    %0 = vector.load %arg0[%c0, %c0_0] : memref<512x16xf32, #tpu.memory_space<vmem>>, vector<512x16xf32>
    %1 = arith.truncf %0 : vector<512x16xf32> to vector<512x16xbf16>
    %c0_1 = arith.constant 0 : index
    %c0_2 = arith.constant 0 : index
    %2 = vector.load %arg1[%c0_1, %c0_2] : memref<16x3xf32, #tpu.memory_space<vmem>>, vector<16x3xf32>
    %3 = arith.truncf %2 : vector<16x3xf32> to vector<16x3xbf16>
    %cst = arith.constant dense<0.000000e+00> : vector<512x3xf32>
    %4 = tpu.matmul %1, %3, %cst {dimension_numbers = #tpu.dot_dimension_numbers<[1], [0], [0], [1], [0, 0, 1, 1], [], []>} : vector<512x16xbf16>, vector<16x3xbf16>, vector<512x3xf32> -> vector<512x3xf32>
    %c0_3 = arith.constant 0 : index
    %c0_4 = arith.constant 0 : index
    %5 = vector.load %arg2[%c0_3, %c0_4] : memref<1x3xf32, #tpu.memory_space<vmem>>, vector<1x3xf32>
    %6 = vector.broadcast %5 : vector<1x3xf32> to vector<512x3xf32>
    %7 = arith.addf %4, %6 : vector<512x3xf32>
    %c0_5 = arith.constant 0 : index
    %c0_6 = arith.constant 0 : index
    %8 = vector.load %arg3[%c0_5, %c0_6] : memref<512x3xf32, #tpu.memory_space<vmem>>, vector<512x3xf32>
    tpu.vector_store %arg3[%c0_5, %c0_6], %7 {strides = array<i32>} : memref<512x3xf32, #tpu.memory_space<vmem>>, vector<512x3xf32>,
    return
  }
}

</mosaic_0001>

<bundles_post_ra>
// kernel: tile.66
= control target key start
LH: loop header
LB: loop body
LE: loop exit
PB: predicated region body
PF: predicated region fallthrough
CT: control target
= control target key end

     0   :  { %s22_s0 = inlined_call_operand.vmem [shape: f32[4], index: 0, kind: input, shape index: {}]   ;;  %s23_s1 = inlined_call_operand.vmem [shape: f32[2,4], index: 1, kind: output, shape index: {}]  }
   0x1   :  { %v4_v0 = vld [vmem:[%s22_s0] ss:$0 sm:$0xff] }
   0x2   :  { %5 = vst [vmem:[%s23_s1] sm:$0x3] %v4_v0 }

// kernel: tile.0
= control target key start
LH: loop header
LB: loop body
LE: loop exit
PB: predicated region body
PF: predicated region fallthrough
CT: control target
= control target key end

     0   :  { %s35_s8 = smov 125   ;;  %vm8_vm0 = vcmask 7168   ;;  %s36_s11 = smov 126   ;;  %s62_s0 = inlined_call_operand.vmem [shape: f32[2,4], index: 0, kind: input, shape index: {}]   ;;  %s63_s1 = inlined_call_operand.vmem [shape: f32[8,1], index: 1, kind: output, shape index: {}]  }
   0x1   :  { %v5_v0 = vld [vmem:[%s62_s0] sm:$0x3]  ;;  %s34_s0 = smov 127  }
   0x2   :  { %6 = vst [vmem:[#allocation0] sm:$0x3] %v5_v0 }
   0x9   :  { %v10_v1 = vld [vmem:[#allocation0] sm:$0x3]  }
   0xa   :  { %v22_v2 = vld [vmem:[#allocation0] sm:$0x3]   ;;  %11 = vrot.lane.b32.xlu0 %v10_v1, %s34_s0 }
   0xb   :  { %23 = vrot.lane.b32.xlu1 %v22_v2, %s35_s8  ;;  %v7_v3 = vld [vmem:[#allocation0] sm:$0x3]  }
   0xc   :  { %v16_v4 = vld [vmem:[#allocation0] sm:$0x3]   ;;  %9 = vst.msk [vmem:[%s63_s1] ss:$4 sm:$0x3] %vm8_vm0, %v7_v3  }
   0xe   :  { %17 = vrot.lane.b32.xlu0 %v16_v4, %s36_s11 }
  0x7c   :  { %v12_v5 = vpop.permute.xlu0 %11  }
  0x7d   :  { %v24_v6 = vpop.permute.xlu1 %23   ;;  %28 = vst.msk [vmem:[%s63_s1 + $0x1] ss:$4 sm:$0x3] %vm8_vm0, %v12_v5  }
  0x7e   :  { %30 = vst.msk [vmem:[%s63_s1 + $0x3] ss:$4 sm:$0x3] %vm8_vm0, %v24_v6  }
  0x80   :  { %v18_v7 = vpop.permute.xlu0 %17  }
  0x81   :  { %29 = vst.msk [vmem:[%s63_s1 + $0x2] ss:$4 sm:$0x3] %vm8_vm0, %v18_v7  }

</bundles_post_ra>
